<compile_context>
chip_gen: v5e
topology: v5e:2x2
jax: 0.10.0
libtpu: 0.0.40
codegen_flags: <defaults>
</compile_context>

<pallas_src>
import jax
import jax.numpy as jnp
from jax.experimental import pallas as pl
from jax.experimental.pallas import tpu as pltpu


def ffn_attention_kernel(key_ref, sq_ref, wke_ref, wk_ref, bk_ref,
                         attn_ref, score_ref):
    k = key_ref[...]                              # (TB, Din, S)  NCW layout, f32
    tb, din, _ = k.shape

    # score[b,s] = sum_d (wo@Wk)[d] * key[b,d,s]  + (query/bias term)
    # (TB,1,Din) @ (TB,Din,S) -> (TB,1,S): batched MXU matmul, lane-dense in S.
    wke = jnp.broadcast_to(wke_ref[...][None, :, :], (tb, 1, din))
    score = jnp.einsum('bod,bds->bos', wke, k,
                       preferred_element_type=jnp.float32)
    score = score + sq_ref[...][:, :, None]       # (TB,1,1) broadcast

    score_ref[...] = score[:, 0, :]               # (TB, S) lane-dense store

    # Softmax over S (lane axis); reciprocal goes to the EUP slot.
    m = jnp.max(score, axis=-1, keepdims=True)
    e = jnp.exp(score - m)
    prob = e * pl.reciprocal(jnp.sum(e, axis=-1, keepdims=True), approx=True)

    # ctx[b,d] = sum_s prob[b,s] * key[b,d,s]:
    # (TB,1,S) x (TB,Din,S) contracting S -> (TB,1,Din): batched MXU matmul.
    ctx = jnp.einsum('bos,bds->bod', prob, k,
                     preferred_element_type=jnp.float32)

    # attn[b] = ctx[b] @ Wk^T + bk   (exact because sum_s prob = 1)
    attn = jnp.einsum('bod,hd->boh', ctx, wk_ref[...],
                      preferred_element_type=jnp.float32)
    attn_ref[...] = attn[:, 0, :] + bk_ref[...]   # (TB,H) + (1,H)


def ffn_attention(query, key, wq, bq, wk, bk, wo, *, batch_block=8):
    """query (B, Din), key (B, S, Din); weights stored PyTorch-style (out, in)."""
    f32 = jnp.float32
    B, Din = query.shape
    S = key.shape[1]
    H = wq.shape[0]

    query = query.astype(f32)
    key = key.astype(f32)
    wq = wq.astype(f32).reshape(H, Din)
    bq = bq.astype(f32).reshape(1, H)
    wk = wk.astype(f32).reshape(H, Din)
    bk = bk.astype(f32).reshape(1, H)
    wo = wo.astype(f32).reshape(1, H)

    # ---- fold the rank-1 out_proj into the other weights (tiny, done once) ----
    wk_eff = wo @ wk                              # (1, Din)   score weight for key
    wq_eff = wo @ wq                              # (1, Din)   score weight for query
    b_eff = jnp.sum(wo * (bq + bk))               # scalar     folded biases
    sq = query @ wq_eff.T + b_eff                 # (B, 1)     per-row score offset

    # Conv1d NCW layout (B, Din, S): S on the lane axis.
    # TODO(synk): at production scale accept key directly as (B, Din, S) to
    #             avoid this wrapper-side transpose pass over HBM.
    key_ncw = jnp.swapaxes(key, 1, 2)             # (B, Din, S)

    tb = max(1, min(batch_block, B))
    bp = pl.cdiv(B, tb) * tb
    if bp != B:                                   # pad batch to a tile multiple
        key_ncw = jnp.pad(key_ncw, ((0, bp - B), (0, 0), (0, 0)))
        sq = jnp.pad(sq, ((0, bp - B), (0, 0)))

    attn, score = pl.pallas_call(
        ffn_attention_kernel,
        out_shape=(
            jax.ShapeDtypeStruct((bp, H), f32),   # attn
            jax.ShapeDtypeStruct((bp, S), f32),   # attn_weight (pre-softmax score)
        ),
        grid_spec=pltpu.PrefetchScalarGridSpec(
            num_scalar_prefetch=0,
            grid=(bp // tb,),
            in_specs=[
                pl.BlockSpec((tb, Din, S), lambda b: (b, 0, 0)),  # key tile (pipelined)
                pl.BlockSpec((tb, 1), lambda b: (b, 0)),          # folded query/bias term
                pl.BlockSpec((1, Din), lambda b: (0, 0)),         # wo @ Wk  (resident)
                pl.BlockSpec((H, Din), lambda b: (0, 0)),         # Wk       (resident)
                pl.BlockSpec((1, H), lambda b: (0, 0)),           # bk       (resident)
            ],
            out_specs=(
                pl.BlockSpec((tb, H), lambda b: (b, 0)),
                pl.BlockSpec((tb, S), lambda b: (b, 0)),
            ),
        ),
        compiler_params=pltpu.CompilerParams(
            dimension_semantics=("parallel",),    # batch tiles independent (megacore on v7x)
            vmem_limit_bytes=32 * 1024 * 1024,
        ),
    )(key_ncw, sq, wk_eff, wk, bk)
    return attn[:B], score[:B]


def reference(query, key, wq, bq, wk, bk, wo):
    # Pure-JAX reference mirroring the (un-folded) PyTorch forward.
    q_h = query @ wq.T + bq                                   # (B, H)
    k_h = jnp.einsum('bsd,hd->bsh', key, wk) + bk             # (B, S, H)
    score = jnp.einsum('bsh,h->bs', q_h[:, None, :] + k_h, wo[0])
    prob = jax.nn.softmax(score, axis=-1)
    attn = jnp.einsum('bsh,bs->bh', k_h, prob)
    return attn, score


if __name__ == "__main__":
    B, S, Din, H = 16, 128, 16, 32

    root = jax.random.PRNGKey(0)
    ks = jax.random.split(root, 8)

    # Inputs
    query = jax.random.normal(ks[0], (B, Din), dtype=jnp.float32)
    key_t = jax.random.normal(ks[1], (B, S, Din), dtype=jnp.float32)

    # Parameters (shapes match the PyTorch module):
    #   q_proj: Linear(Din, H)      -> Wq (H, Din), bq (H,)
    #   k_proj: Conv1d(Din, H, 1)   -> Wk (H, Din, 1) == (H, Din), bk (H,)
    #   out_proj: Linear(H, 1, bias=False), uniform(-1, 1) -> Wo (1, H)
    lim = 1.0 / jnp.sqrt(Din)
    wq = jax.random.uniform(ks[2], (H, Din), minval=-lim, maxval=lim)
    bq = jax.random.uniform(ks[3], (1, H), minval=-lim, maxval=lim)
    wk = jax.random.uniform(ks[4], (H, Din), minval=-lim, maxval=lim)
    bk = jax.random.uniform(ks[5], (1, H), minval=-lim, maxval=lim)
    wo = jax.random.uniform(ks[6], (1, H), minval=-1.0, maxval=1.0)

    attn, attn_weight = ffn_attention(query, key_t, wq, bq, wk, bk, wo)
    jax.block_until_ready((attn, attn_weight))

    ref_attn, ref_score = reference(query, key_t, wq, bq, wk, bk, wo)
    assert attn.shape == (B, H) and attn_weight.shape == (B, S)
    # score is exact algebra (only summation-order fp drift)
    assert jnp.allclose(attn_weight, ref_score, atol=1e-4, rtol=1e-4)
    # attn additionally uses the EUP approximate reciprocal in the softmax
    assert jnp.allclose(attn, ref_attn, atol=2e-3, rtol=2e-3)

    print("KERNEL_OK")
</pallas_src>

<mosaic_0001>
module attributes {stable_mosaic.version = 11 : i64} {
  func.func @ffn_attention_kernel(%arg0: i32, %arg1: memref<8x16x128xf32, #tpu.memory_space<vmem>>, %arg2: memref<8x1xf32, #tpu.memory_space<vmem>>, %arg3: memref<1x16xf32, #tpu.memory_space<vmem>>, %arg4: memref<32x16xf32, #tpu.memory_space<vmem>>, %arg5: memref<1x32xf32, #tpu.memory_space<vmem>>, %arg6: memref<8x32xf32, #tpu.memory_space<vmem>>, %arg7: memref<8x128xf32, #tpu.memory_space<vmem>>) attributes {dimension_semantics = [#tpu.dimension_semantics<parallel>], iteration_bounds = array<i64: 2>, scalar_prefetch = 0 : i64, scratch_operands = 0 : i64, tpu.core_type = #tpu.core_type<tc>, window_params = [{transform_indices = @transform_0, window_bounds = array<i64: 8, 16, 128>}, {transform_indices = @transform_1, window_bounds = array<i64: 8, 1>}, {pipeline_mode = #tpu.pipeline_mode<synchronous>, transform_indices = @transform_2, window_bounds = array<i64: 1, 16>}, {pipeline_mode = #tpu.pipeline_mode<synchronous>, transform_indices = @transform_3, window_bounds = array<i64: 32, 16>}, {pipeline_mode = #tpu.pipeline_mode<synchronous>, transform_indices = @transform_4, window_bounds = array<i64: 1, 32>}, {transform_indices = @transform_5, window_bounds = array<i64: 8, 32>}, {transform_indices = @transform_6, window_bounds = array<i64: 8, 128>}]} {
    %c0 = arith.constant 0 : index
    %c0_0 = arith.constant 0 : index
    %c0_1 = arith.constant 0 : index
    %0 = vector.load %arg1[%c0, %c0_0, %c0_1] : memref<8x16x128xf32, #tpu.memory_space<vmem>>, vector<8x16x128xf32>
    %c0_2 = arith.constant 0 : index
    %c0_3 = arith.constant 0 : index
    %1 = vector.load %arg3[%c0_2, %c0_3] : memref<1x16xf32, #tpu.memory_space<vmem>>, vector<1x16xf32>
    %2 = vector.shape_cast %1 : vector<1x16xf32> to vector<1x1x16xf32>
    %3 = vector.shape_cast %2 : vector<1x1x16xf32> to vector<1x1x16xf32>
    %4 = vector.broadcast %3 : vector<1x1x16xf32> to vector<8x1x16xf32>
    "tpu.trace_start"() <{level = 10 : i32, message = "bod,bds->bos"}> : () -> ()
    %cst = arith.constant dense<0.000000e+00> : vector<8x1x128xf32>
    %5 = tpu.matmul %4, %0, %cst {dimension_numbers = #tpu.dot_dimension_numbers<[2], [1], [1], [2], [0, 0, 0, 1, 1, 2], [0], [0]>} : vector<8x1x16xf32>, vector<8x16x128xf32>, vector<8x1x128xf32> -> vector<8x1x128xf32>
    "tpu.trace_stop"() : () -> ()
    %c0_4 = arith.constant 0 : index
    %c0_5 = arith.constant 0 : index
    %6 = vector.load %arg2[%c0_4, %c0_5] : memref<8x1xf32, #tpu.memory_space<vmem>>, vector<8x1xf32>
    %7 = vector.shape_cast %6 : vector<8x1xf32> to vector<8x1x1xf32>
    %8 = vector.broadcast %7 : vector<8x1x1xf32> to vector<8x1x128xf32>
    %9 = arith.addf %5, %8 : vector<8x1x128xf32>
    %10 = vector.shape_cast %9 : vector<8x1x128xf32> to vector<8x128xf32>
    %c0_6 = arith.constant 0 : index
    %c0_7 = arith.constant 0 : index
    %11 = vector.load %arg7[%c0_6, %c0_7] : memref<8x128xf32, #tpu.memory_space<vmem>>, vector<8x128xf32>
    tpu.vector_store %arg7[%c0_6, %c0_7], %10 {strides = array<i32>} : memref<8x128xf32, #tpu.memory_space<vmem>>, vector<8x128xf32>,
    %cst_8 = arith.constant dense<0xFF800000> : vector<8x1xf32>
    %12 = vector.multi_reduction <maximumf>, %9, %cst_8 [2] : vector<8x1x128xf32> to vector<8x1xf32>
    %13 = vector.shape_cast %12 : vector<8x1xf32> to vector<8x1x1xf32>
    %14 = vector.broadcast %13 : vector<8x1x1xf32> to vector<8x1x128xf32>
    %15 = arith.subf %9, %14 : vector<8x1x128xf32>
    %16 = math.exp %15 : vector<8x1x128xf32>
    %cst_9 = arith.constant dense<0.000000e+00> : vector<8x1xf32>
    %17 = vector.multi_reduction <add>, %16, %cst_9 [2] : vector<8x1x128xf32> to vector<8x1xf32>
    %18 = vector.shape_cast %17 : vector<8x1xf32> to vector<8x1x1xf32>
    %19 = tpu.reciprocal %18 {approx = true} : vector<8x1x1xf32> -> vector<8x1x1xf32>
    %20 = vector.broadcast %19 : vector<8x1x1xf32> to vector<8x1x128xf32>
    %21 = arith.mulf %16, %20 : vector<8x1x128xf32>
    "tpu.trace_start"() <{level = 10 : i32, message = "bos,bds->bod"}> : () -> ()
    %cst_10 = arith.constant dense<0.000000e+00> : vector<8x1x16xf32>
    %22 = tpu.matmul %21, %0, %cst_10 {dimension_numbers = #tpu.dot_dimension_numbers<[2], [2], [1], [1], [0, 0, 0, 1, 1, 1], [0], [0]>} : vector<8x1x128xf32>, vector<8x16x128xf32>, vector<8x1x16xf32> -> vector<8x1x16xf32>
    "tpu.trace_stop"() : () -> ()
    %c0_11 = arith.constant 0 : index
    %c0_12 = arith.constant 0 : index
    %23 = vector.load %arg4[%c0_11, %c0_12] : memref<32x16xf32, #tpu.memory_space<vmem>>, vector<32x16xf32>
    "tpu.trace_start"() <{level = 10 : i32, message = "bod,hd->boh"}> : () -> ()
    %cst_13 = arith.constant dense<0.000000e+00> : vector<8x1x32xf32>
    %24 = tpu.matmul %22, %23, %cst_13 {dimension_numbers = #tpu.dot_dimension_numbers<[2], [1], [0, 1], [0], [0, 0, 0, 1, 1, 0], [], []>} : vector<8x1x16xf32>, vector<32x16xf32>, vector<8x1x32xf32> -> vector<8x1x32xf32>
    "tpu.trace_stop"() : () -> ()
    %25 = vector.shape_cast %24 : vector<8x1x32xf32> to vector<8x32xf32>
    %c0_14 = arith.constant 0 : index
    %c0_15 = arith.constant 0 : index
    %26 = vector.load %arg5[%c0_14, %c0_15] : memref<1x32xf32, #tpu.memory_space<vmem>>, vector<1x32xf32>
    %27 = vector.broadcast %26 : vector<1x32xf32> to vector<8x32xf32>
    %28 = arith.addf %25, %27 : vector<8x32xf32>
    %c0_16 = arith.constant 0 : index
    %c0_17 = arith.constant 0 : index
    %29 = vector.load %arg6[%c0_16, %c0_17] : memref<8x32xf32, #tpu.memory_space<vmem>>, vector<8x32xf32>
    tpu.vector_store %arg6[%c0_16, %c0_17], %28 {strides = array<i32>} : memref<8x32xf32, #tpu.memory_space<vmem>>, vector<8x32xf32>,
    return
  }
  func.func @transform_0(%arg0: i32) -> (i32, i32, i32) {
    %c0_i32 = arith.constant 0 : i32
    %c0_i32_0 = arith.constant 0 : i32
    %c0_i32_1 = arith.constant 0 : i32
    return %arg0, %c0_i32, %c0_i32_0 : i32, i32, i32
  }
  func.func @transform_1(%arg0: i32) -> (i32, i32) {
    %c0_i32 = arith.constant 0 : i32
    %c0_i32_0 = arith.constant 0 : i32
    return %arg0, %c0_i32 : i32, i32
  }
  func.func @transform_2(%arg0: i32) -> (i32, i32) {
    %c0_i32 = arith.constant 0 : i32
    %c0_i32_0 = arith.constant 0 : i32
    %c0_i32_1 = arith.constant 0 : i32
    return %c0_i32, %c0_i32_0 : i32, i32
  }
  func.func @transform_3(%arg0: i32) -> (i32, i32) {
    %c0_i32 = arith.constant 0 : i32
    %c0_i32_0 = arith.constant 0 : i32
    %c0_i32_1 = arith.constant 0 : i32
    return %c0_i32, %c0_i32_0 : i32, i32
  }
  func.func @transform_4(%arg0: i32) -> (i32, i32) {
    %c0_i32 = arith.constant 0 : i32
    %c0_i32_0 = arith.constant 0 : i32
    %c0_i32_1 = arith.constant 0 : i32
    return %c0_i32, %c0_i32_0 : i32, i32
  }
  func.func @transform_5(%arg0: i32) -> (i32, i32) {
    %c0_i32 = arith.constant 0 : i32
    %c0_i32_0 = arith.constant 0 : i32
    return %arg0, %c0_i32 : i32, i32
  }
  func.func @transform_6(%arg0: i32) -> (i32, i32) {
    %c0_i32 = arith.constant 0 : i32
    %c0_i32_0 = arith.constant 0 : i32
    return %arg0, %c0_i32 : i32, i32
  }
}

</mosaic_0001>

<bundles_post_ra>
// kernel: tpu_custom_call.1
= control target key start
LH: loop header
LB: loop body
LE: loop exit
PB: predicated region body
PF: predicated region fallthrough
CT: control target
= control target key end

     0   :  { %12 = vsyncpa [#allocation3], 0  ;;  %s1583_s0 = inlined_call_operand.hbm [shape: f32[16,16,128], index: 0, kind: input, shape index: {}]   ;;  %s1584_s1 = inlined_call_operand.vmem [shape: f32[16,1], index: 1, kind: input, shape index: {}]   ;;  %s1585_s2 = inlined_call_operand.vmem [shape: f32[1,16], index: 2, kind: input, shape index: {}]   ;;  %s1586_s3 = inlined_call_operand.vmem [shape: f32[32,16], index: 3, kind: input, shape index: {}]   ;;  %s1587_s4 = inlined_call_operand.vmem [shape: f32[1,32], index: 4, kind: input, shape index: {}]   ;;  %s1588_s5 = inlined_call_operand.hbm [shape: f32[16,32], index: 5, kind: output, shape index: {0}]   ;;  %s1589_s6 = inlined_call_operand.hbm [shape: f32[16,128], index: 6, kind: output, shape index: {1}]  }
   0x1   :  { %14 = vsyncpa [#allocation3 + $0x1], 0 }
   0x2   :  { %15 = vsyncpa [#allocation4], 0 }
   0x3   :  { %17 = vsyncpa [#allocation4 + $0x1], 0 }
   0x4   :  { %18 = vsyncpa [#allocation7], 0 }
   0x5   :  { %20 = vsyncpa [#allocation7 + $0x1], 0  ;;  %s1319_s21 = smov 0   ;;  %s1321_s22 = smov 0  }
   0x6   :  { %s1323_s23 = smov 0   ;;  %s1325_s24 = smov 0  }
   0x7 LB: > { %s1340_s25 = sadd.s32 4294967295, %s1279_s24   ;;  %s1028_s26 = sadd.s32 4294967294, %s1279_s24   ;;  %s1279_s24 = sphi %s1325_s24, %s1601_s24   ;;  %s1275_s23 = sphi %s1323_s23, %s1600_s23   ;;  %s1271_s22 = sphi %s1321_s22, %s1599_s22   ;;  %s1267_s21 = sphi %s1319_s21, %s1598_s21  }
   0x8   : > { %s1344_s27 = sadd.s32 1, %s1279_s24   ;;  %s33_s28 = sadd.s32 1, %s1275_s23 }
   0x9   : > { %s30_s29 = ssub.s32 %s1279_s24, %s1344_s27  ;;  %p40_p0 = scmp.ne.s32.totalorder %s1275_s23, %s1271_s22 }
   0xa   : > { %p31_p1 = scmp.eq.s32.totalorder %s30_s29, 0  ;;  %p41_p2 = scmp.eq.s32.totalorder %s1279_s24, 0 }
   0xb   : > { %p46_p3 = scmp.ne.s32.totalorder %s1271_s22, %s1267_s21  ;;  %p47_p4 = scmp.eq.s32.totalorder %s1340_s25, 0 }
   0xc   : > { %s1356_s30 = scalar_select %p31_p1, %s1275_s23, %s33_s28  }
   0xd   : > { %p1358_p5 = por %p41_p2, %p40_p0  ;;  %p1362_p6 = por %p47_p4, %p46_p3 }
   0xe   : > { %p159_p7 = scmp.eq.s32.totalorder %s1340_s25, 1  ;;  %p165_p8 = scmp.eq.s32.totalorder %s1028_s26, 1 }
   0xf   : > { %p1078_p10 = scmp.lt.s32.totalorder %s1279_s24, 2  ;;  %s220_s11 = sand.u32 1, %s1275_s23  }
  0x10   : > { %p1369_p11 = por %p159_p7, %p40_p0  ;;  %p1373_p12 = por %p165_p8, %p46_p3 }
  0x11   : > { %s1060_s12 = sshll.u32 %s1279_s24, 7  ;;  %s1031_s13 = sshll.u32 %s220_s11, 7 }
  0x12   : > { %s230_s16 = scalar_lea.hbm %s1583_s0, %s1060_s12  ;;  %s224_s18 = scalar_lea.vmem [#allocation2], %s1031_s13 }
  0x13   : > { %s231_s17 = sshll.u32 %s230_s16, 4  ;;  %s233_s19 = sshll.u32 %s224_s18, 4  ;;  %s232_s17 = int_to_ptr.hbm [resolvable:$true] %s231_s17  ;;  %s234_s19 = int_to_ptr.vmem [resolvable:$true] %s233_s19 }
  0x14   : > { %p1384_p13 = pnand %p1078_p10, %p1358_p5  ;;  %p1035_p0 = scmp.ge.s32.totalorder %s1279_s24, 1 }
  0x15   : > { %p248_p1 = scmp.lt.s32.totalorder %s1279_s24, 3  ;;  %s221_s26 = scalar_lea.sflag [#allocation3], %s220_s11 }
  0x16   : > { %s1151_s28 = sshra.s32 %s232_s17, 4  ;;  %p1155_p3 = pneg %p1384_p13  ;;  %s1152_s28 = int_to_ptr.hbm [resolvable:$true] %s1151_s28 }
  0x17   : > { %s1153_s29 = scalar_lea.hbm %s1152_s28, 128  ;;  %s1158_s7 = scalar_lea.hbm %s1583_s0, 256 }
  0x18   : > { %p1154_p2 = scmp.ne.s32.totalorder %s1152_s28, %s1153_s29  ;;  %p1159_p5 = scmp.lt.s32.totalorder %s1152_s28, %s1583_s0 }
  0x19   : > { %p1160_p8 = scmp.lt.s32.totalorder %s1158_s7, %s1153_s29 }
  0x1a   : > { %p1156_p4 = pnand %p1155_p3, %p1154_p2 }
  0x1b   : > { %p1161_p10 = por %p1160_p8, %p1159_p5 }
  0x1c   : > { %p1157_p7 = pneg %p1156_p4 }
  0x1e   : > { %p1162_p9 = pnand %p1161_p10, %p1157_p7 }
  0x20   : > { %1165 = shalt.err (!%p1162_p9)
}
  0x21   : > { %s1281_s11 = smov 128   ;;  %s1282_s16 = smov 8  }
  0x22   : > { %1070 = dma.hbm_to_vmem [thread:$0]  (!%p1384_p13), %s232_s17, 2048, %s234_s19, %s221_s26, %s1281_s11, %s1281_s11, %s1282_s16  }
  0x23   : > { %p249_p2 = pnand %p1035_p0, %p248_p1 }
  0x24   : > { %s1405_s18 = sand.u32 (!%p249_p2), 1, %s1271_s22  }
  0x25   : > { %252 = sbr.rel (%p249_p2) target bundleno = 724 (0x2d4), region = 40  ;;  %s1036_s28 = sshll.u32 (!%p249_p2), %s1405_s18, 7 }
  0x26   : > { %s255_s29 = scalar_lea.sflag (!%p249_p2), [#allocation3], %s1405_s18  ;;  %s1409_s12 = scalar_lea.vmem (!%p249_p2), [#allocation2], %s1036_s28 }
  0x2a   : > { %1254 = dma.done.wait (%p1362_p6), %s255_s29, 2048  }
  0x2b   : > { %1256 = vsyncadd (%p1362_p6), %s255_s29, 4294965248  ;;  %p298_p9 = scmp.lt.s32.totalorder %s1340_s25, 1  ;;  %v1283_v0 = vmov 0   ;;  %v303_v1 = vld [vmem:[%s1409_s12 + $0x8] sm:$0xff]  ;;  %v309_v3 = vld [vmem:[%s1409_s12 + $0x38] sm:$0xff]  ;;  %vm368_vm0 = vcmask 130048  }
  0x2c   : > { %1116 = vset.pattern.permute.xlu0 %v1283_v0  ;;  %1115 = vset.pattern.permute.xlu1 %v1283_v0  ;;  %v307_v2 = vld [vmem:[%s1409_s12 + $0x28] sm:$0xff]  ;;  %v302_v5 = vld [vmem:[%s1409_s12] sm:$0xff]  ;;  %v308_v8 = vld [vmem:[%s1409_s12 + $0x30] sm:$0xff]  ;;  %vm563_vm1 = vcmask 1040384   ;;  %vm541_vm2 = vcmask 1041409   ;;  %vm544_vm3 = vcmask 1042434  }
  0x2d   : > { %s299_s17 = scalar_select %p298_p9, %s1340_s25, 1  ;;  %1117 = vset.pattern.permute.xlu2 %v1283_v0  ;;  %386 = vmatpush.msra.mxu1 %v303_v1  ;;  %v306_v6 = vld [vmem:[%s1409_s12 + $0x20] sm:$0xff]  ;;  %v311_v10 = vld [vmem:[%s1409_s12 + $0x48] sm:$0xff]  ;;  %v305_v11 = vld [vmem:[%s1409_s12 + $0x18] sm:$0xff]  ;;  %vm547_vm4 = vcmask 1043459   ;;  %vm550_vm5 = vcmask 1044484  }
  0x2e   : > { %426 = vmatpush.msra.mxu2 %v307_v2  ;;  %446 = vmatpush.msra.mxu3 %v309_v3  ;;  %v318_v9 = vld [vmem:[%s1585_s2] sm:$0x1]  ;;  %v317_v12 = vld [vmem:[%s1409_s12 + $0x78] sm:$0xff]  ;;  %v315_v14 = vld [vmem:[%s1409_s12 + $0x68] sm:$0xff]  ;;  %vm553_vm6 = vcmask 1045509   ;;  %s1590_s14 = sshll.u32 %s1405_s18, 3 }
  0x2f   : > { %s1039_s19 = sshll.u32 %s299_s17, 3  ;;  %387 = vmatpush.msra.mxu1 %v302_v5  ;;  %v310_v13 = vld [vmem:[%s1409_s12 + $0x40] sm:$0xff]  ;;  %466 = vmatpush.msra.mxu0 %v311_v10  ;;  %v304_v16 = vld [vmem:[%s1409_s12 + $0x10] sm:$0xff]  ;;  %v313_v20 = vld [vmem:[%s1409_s12 + $0x58] sm:$0xff]  ;;  %vm556_vm7 = vcmask 1046534   ;;  %vm559_vm8 = vcmask 1047559  }
  0x30   : > { %s301_s8 = scalar_lea.vmem %s1584_s1, %s1039_s19  ;;  %427 = vmatpush.msra.mxu2 %v306_v6  ;;  %447 = vmatpush.msra.mxu3 %v308_v8  ;;  %v316_v17 = vld [vmem:[%s1409_s12 + $0x70] sm:$0xff]  ;;  %v314_v19 = vld [vmem:[%s1409_s12 + $0x60] sm:$0xff]  ;;  %s1485_s15 = scalar_lea.vmem [#allocation6], %s1590_s14 }
  0x31   : > { %v319_v4 = vld [vmem:[%s301_s8] sm:$0xff]  ;;  %1040 = vmatmul.msk.f32.vlgmr.msra.gmra.mxu1 %vm368_vm0, %v318_v9  ;;  %1042 = vmatmul.msk.f32.vlgmr.msra.gmra.mxu2 %vm368_vm0, %v318_v9  ;;  %v312_v22 = vld [vmem:[%s1409_s12 + $0x50] sm:$0xff]  ;;  %s1055_s26 = sshll.u32 %s1340_s25, 3  ;;  %s910_s11 = sshll.u32 %s1485_s15, 4  ;;  %s911_s11 = int_to_ptr.vmem [resolvable:$true] %s910_s11 }
  0x32   : > { %329 = vperm.xlu1 %1115, %v319_v4   ;;  %v322_v7 = vrot.slane %v319_v4, 2  ;;  %1043 = vmatmul.msk.f32.vlgmr.msra.gmra.mxu3 %vm368_vm0, %v318_v9  ;;  %v321_v15 = vrot.slane %v319_v4, 1  ;;  %v323_v18 = vrot.slane %v319_v4, 3  ;;  %v326_v21 = vrot.slane %v319_v4, 6  ;;  %s908_s7 = scalar_lea.hbm %s1589_s6, %s1055_s26  ;;  %s884_s28 = scalar_lea.sflag [#allocation7], %s1405_s18 }
  0x33   : > { %406 = vmatpush.msrb.mxu1 %v305_v11  ;;  %526 = vmatpush.msrb.mxu3 %v317_v12  ;;  %v325_v23 = vrot.slane %v319_v4, 5  ;;  %v324_v24 = vrot.slane %v319_v4, 4  ;;  %v327_v25 = vrot.slane %v319_v4, 7  ;;  %s912_s16 = sshll.u32 %s908_s7, 4  ;;  %s1201_s19 = scalar_lea.hbm %s1589_s6, 16  ;;  %s913_s16 = int_to_ptr.hbm [resolvable:$true] %s912_s16 }
  0x34   : > { %339 = vperm.xlu0 %1116, %v322_v7   ;;  %467 = vmatpush.msra.mxu0 %v310_v13  ;;  %s1195_s29 = sshra.s32 %s913_s16, 4  ;;  %s1196_s29 = int_to_ptr.hbm [resolvable:$true] %s1195_s29 }
  0x35   : > { %506 = vmatpush.msrb.mxu2 %v315_v14  ;;  %1044 = vmatmul.msk.f32.vlgmr.msra.gmra.mxu0 %vm368_vm0, %v318_v9  ;;  %s1197_s12 = scalar_lea.hbm %s1196_s29, 8  ;;  %p1202_p1 = scmp.lt.s32.totalorder %s1196_s29, %s1589_s6 }
  0x36   : > { %407 = vmatpush.msrb.mxu1 %v304_v16  ;;  %527 = vmatpush.msrb.mxu3 %v316_v17  ;;  %p1198_p6 = scmp.ne.s32.totalorder %s1196_s29, %s1197_s12  ;;  %p1203_p3 = scmp.lt.s32.totalorder %s1201_s19, %s1197_s12 }
  0x37   : > { %507 = vmatpush.msrb.mxu2 %v314_v19  ;;  %359 = vperm.xlu2 %1117, %v326_v21  }
  0x38   : > { %486 = vmatpush.msra.mxu1 %v313_v20  ;;  %666 = vmatpush.xpose.msrb.mxu0 %v303_v1  ;;  %p1199_p13 = pnand %p1198_p6, %p1369_p11  ;;  %p1204_p4 = por %p1203_p3, %p1202_p1 }
  0x39   : > { %1041 = vmatmul.msk.f32.vlgmr.msrb.gmra.mxu1 %vm368_vm0, %v318_v9  ;;  %1046 = vmatmul.msk.f32.vlgmr.msrb.gmra.mxu2 %vm368_vm0, %v318_v9 }
  0x3a   : > { %334 = vperm.xlu1 %1115, %v321_v15   ;;  %1047 = vmatmul.msk.f32.vlgmr.msrb.gmra.mxu3 %vm368_vm0, %v318_v9  ;;  %p1200_p0 = pneg %p1199_p13 }
  0x3b   : > { %487 = vmatpush.msra.mxu1 %v312_v22  ;;  %706 = vmatpush.xpose.msra.mxu2 %v307_v2 }
  0x3c   : > { %344 = vperm.xlu0 %1116, %v323_v18   ;;  %726 = vmatpush.xpose.msra.mxu3 %v309_v3  ;;  %p1205_p7 = pnand %p1204_p4, %p1200_p0 }
  0x3d   : > { %686 = vmatpush.xpose.msrb.mxu1 %v305_v11  ;;  %667 = vmatpush.xpose.msrb.mxu0 %v302_v5 }
  0x3f   : > { %707 = vmatpush.xpose.msra.mxu2 %v306_v6  ;;  %364 = vperm.xlu2 %1117, %v327_v25  }
  0x40   : > { %727 = vmatpush.xpose.msra.mxu3 %v308_v8 }
  0x41   : > { %1045 = vmatmul.msk.f32.vlgmr.msra.gmra.mxu1 %vm368_vm0, %v318_v9  ;;  %746 = vmatpush.xpose.msra.mxu0 %v311_v10 }
  0x42   : > { %354 = vperm.xlu1 %1115, %v325_v23   ;;  %687 = vmatpush.xpose.msrb.mxu1 %v304_v16 }
  0x43   : > { %786 = vmatpush.xpose.msrb.mxu2 %v315_v14 }
  0x44   : > { %349 = vperm.xlu0 %1116, %v324_v24   ;;  %806 = vmatpush.xpose.msrb.mxu3 %v317_v12 }
  0x45   : > { %747 = vmatpush.xpose.msra.mxu0 %v310_v13 }
  0x46   : > { %766 = vmatpush.xpose.msra.mxu1 %v313_v20 }
  0x47   : > { %787 = vmatpush.xpose.msrb.mxu2 %v314_v19 }
  0x48   : > { %807 = vmatpush.xpose.msrb.mxu3 %v316_v17 }
  0x4a   : > { %767 = vmatpush.xpose.msra.mxu1 %v312_v22 }
  0x91   : > { %v360_v30 = vpop.permute.xlu2 %359 }
  0x92   : > { %v362_v51 = vperm.slane %v360_v30, 0 }
  0x99   : > { %v365_v49 = vpop.permute.xlu2 %364 }
  0x9a   : > { %v367_v56 = vperm.slane %v365_v49, 0 }
  0xa4   : > { %v330_v27 = vpop.permute.xlu1 %329 }
  0xa5   : > { %v332_v29 = vperm.slane %v330_v27, 0 }
  0xa6   : > { %v340_v26 = vpop.permute.xlu0 %339 }
  0xa7   : > { %v342_v34 = vperm.slane %v340_v26, 0 }
  0xac   : > { %v335_v33 = vpop.permute.xlu1 %334 }
  0xad   : > { %v337_v41 = vperm.slane %v335_v33, 0 }
  0xae   : > { %v345_v28 = vpop.permute.xlu0 %344  ;;  %v389_v31 = vpop.f32.mrf.mxu1 }
  0xaf   : > { %v1447_v32 = vadd.f32 %v389_v31, %v332_v29  ;;  %v347_v36 = vperm.slane %v345_v28, 0 }
  0xb1   : > { %v564_v35 = vsel %vm563_vm1, %v1447_v32, -inf }
  0xb2   : > { %565 = vmax.xlane.f32.xlu1 %v564_v35  ;;  %v469_v38 = vpop.f32.mrf.mxu0 }
  0xb4   : > { %v429_v40 = vpop.f32.mrf.mxu2  ;;  %v355_v54 = vpop.permute.xlu1 %354 }
  0xb5   : > { %v1451_v42 = vadd.f32 %v429_v40, %v342_v34  ;;  %v449_v43 = vpop.f32.mrf.mxu3  ;;  %v357_v60 = vperm.slane %v355_v54, 0 }
  0xb6   : > { %v350_v37 = vpop.permute.xlu0 %349  ;;  %v450_v45 = vadd.f32 %v449_v43, %v347_v36  ;;  %v409_v46 = vpop.f32.mrf.mxu1 }
  0xb7   : > { %v352_v39 = vperm.slane %v350_v37, 0  ;;  %v1455_v47 = vadd.f32 %v409_v46, %v337_v41  ;;  %v570_v48 = vsel %vm563_vm1, %v1451_v42, -inf  ;;  %v543_v55 = vrot.slane %v1451_v42, 6 }
  0xb8   : > { %v573_v50 = vsel %vm563_vm1, %v450_v45, -inf  ;;  %571 = vmax.xlane.f32.xlu2 %v570_v48  ;;  %v546_v61 = vrot.slane %v450_v45, 5 }
  0xb9   : > { %v1453_v44 = vadd.f32 %v469_v38, %v352_v39  ;;  %v540_v52 = vrot.slane %v1455_v47, 7  ;;  %574 = vmax.xlane.f32.xlu0 %v573_v50  ;;  %v567_v3 = vsel %vm563_vm1, %v1455_v47, -inf }
  0xbb   : > { %v576_v53 = vsel %vm563_vm1, %v1453_v44, -inf  ;;  %v542_v57 = vsel %vm541_vm2, %v540_v52, %v1447_v32  ;;  %v549_v5 = vrot.slane %v1453_v44, 4 }
  0xbc   : > { %577 = vmax.xlane.f32.xlu1 %v576_v53  ;;  %v509_v58 = vpop.f32.mrf.mxu2  ;;  %v545_v59 = vsel %vm544_vm3, %v543_v55, %v542_v57 }
  0xbd   : > { %v529_v62 = vpop.f32.mrf.mxu3  ;;  %v1467_v63 = vadd.f32 %v509_v58, %v362_v51  ;;  %v548_v4 = vsel %vm547_vm4, %v546_v61, %v545_v59 }
  0xbe   : > { %v530_v0 = vadd.f32 %v529_v62, %v367_v56  ;;  %v489_v1 = vpop.f32.mrf.mxu1  ;;  %v551_v10 = vsel %vm550_vm5, %v549_v5, %v548_v4 }
  0xbf   : > { %v1469_v2 = vadd.f32 %v489_v1, %v357_v60  ;;  %v555_v6 = vrot.slane %v1467_v63, 2  ;;  %v582_v14 = vsel %vm563_vm1, %v1467_v63, -inf }
  0xc0   : > { %v585_v7 = vsel %vm563_vm1, %v530_v0, -inf  ;;  %568 = vmax.xlane.f32.xlu2 %v567_v3  ;;  %v558_v8 = vrot.slane %v530_v0, 1 }
  0xc1   : > { %v552_v9 = vrot.slane %v1469_v2, 3  ;;  %586 = vmax.xlane.f32.xlu0 %v585_v7  ;;  %v579_v15 = vsel %vm563_vm1, %v1469_v2, -inf }
  0xc3   : > { %v554_v11 = vsel %vm553_vm6, %v552_v9, %v551_v10 }
  0xc4   : > { %v557_v12 = vsel %vm556_vm7, %v555_v6, %v554_v11 }
  0xc5   : > { %v560_v13 = vsel %vm559_vm8, %v558_v8, %v557_v12 }
  0xc6   : > { %562 = vst [vmem:[%s1485_s15] sm:$0xff] %v560_v13 }
  0xc8   : > { %583 = vmax.xlane.f32.xlu2 %v582_v14 }
  0xd0   : > { %580 = vmax.xlane.f32.xlu2 %v579_v15 }
 0x125   : > { %v566_v16 = vpop.xlane.xlu1 %565 }
 0x126   : > { %v588_v17 = vsub.f32 %v1447_v32, %v566_v16  ;;  %v815_v16 = vld [vmem:[%s1586_s3 + $0x18] sm:$0xff] }
 0x128   : > { %v596_v18 = vmul.f32 1.442695, %v588_v17  ;;  %v814_v17 = vld [vmem:[%s1586_s3 + $0x10] sm:$0xff] }
 0x12a   : > { %1119 = vpow2.f32 %v596_v18  ;;  %v813_v18 = vld [vmem:[%s1586_s3 + $0x8] sm:$0xff] }
 0x12b   : > { %v572_v19 = vpop.xlane.xlu2 %571 }
 0x12c   : > { %v575_v20 = vpop.xlane.xlu0 %574  ;;  %v590_v21 = vsub.f32 %v1451_v42, %v572_v19  ;;  %v812_v19 = vld [vmem:[%s1586_s3] sm:$0xff] }
 0x12d   : > { %v591_v22 = vsub.f32 %v450_v45, %v575_v20 }
 0x12e   : > { %v600_v23 = vmul.f32 1.442695, %v590_v21 }
 0x12f   : > { %v602_v24 = vmul.f32 1.442695, %v591_v22  ;;  %v578_v27 = vpop.xlane.xlu1 %577 }
 0x130   : > { %v1120_v25 = vpop.eup %1119  ;;  %1121 = vpow2.f32 %v600_v23  ;;  %v592_v33 = vsub.f32 %v1453_v44, %v578_v27 }
 0x131   : > { %1123 = vpow2.f32 %v602_v24  ;;  %v612_v26 = vsel %vm563_vm1, %v1120_v25, 0.0 }
 0x132   : > { %613 = vadd.xlane.f32.xlu2 %v612_v26  ;;  %v604_v39 = vmul.f32 1.442695, %v592_v33 }
 0x133   : > { %v569_v28 = vpop.xlane.xlu2 %568 }
 0x134   : > { %v587_v29 = vpop.xlane.xlu0 %586  ;;  %v589_v30 = vsub.f32 %v1455_v47, %v569_v28 }
 0x135   : > { %v595_v31 = vsub.f32 %v530_v0, %v587_v29 }
 0x136   : > { %v1122_v32 = vpop.eup %1121  ;;  %v598_v34 = vmul.f32 1.442695, %v589_v30 }
 0x137   : > { %v1124_v35 = vpop.eup %1123  ;;  %v610_v36 = vmul.f32 1.442695, %v595_v31  ;;  %v618_v37 = vsel %vm563_vm1, %v1122_v32, 0.0 }
 0x138   : > { %1125 = vpow2.f32 %v598_v34  ;;  %619 = vadd.xlane.f32.xlu0 %v618_v37  ;;  %v621_v38 = vsel %vm563_vm1, %v1124_v35, 0.0 }
 0x139   : > { %1127 = vpow2.f32 %v610_v36  ;;  %622 = vadd.xlane.f32.xlu1 %v621_v38 }
 0x13a   : > { %1129 = vpow2.f32 %v604_v39 }
 0x13b   : > { %v584_v40 = vpop.xlane.xlu2 %583 }
 0x13c   : > { %v594_v41 = vsub.f32 %v1467_v63, %v584_v40 }
 0x13e   : > { %v1126_v42 = vpop.eup %1125  ;;  %v608_v43 = vmul.f32 1.442695, %v594_v41 }
 0x13f   : > { %v1128_v45 = vpop.eup %1127  ;;  %v615_v44 = vsel %vm563_vm1, %v1126_v42, 0.0 }
 0x140   : > { %1131 = vpow2.f32 %v608_v43  ;;  %616 = vadd.xlane.f32.xlu0 %v615_v44  ;;  %v633_v46 = vsel %vm563_vm1, %v1128_v45, 0.0  ;;  %v1130_v48 = vpop.eup %1129 }
 0x141   : > { %634 = vadd.xlane.f32.xlu2 %v633_v46  ;;  %v624_v53 = vsel %vm563_vm1, %v1130_v48, 0.0 }
 0x143   : > { %v581_v47 = vpop.xlane.xlu2 %580 }
 0x144   : > { %v593_v49 = vsub.f32 %v1469_v2, %v581_v47 }
 0x146   : > { %v1132_v50 = vpop.eup %1131  ;;  %v606_v51 = vmul.f32 1.442695, %v593_v49 }
 0x147   : > { %v630_v52 = vsel %vm563_vm1, %v1132_v50, 0.0 }
 0x148   : > { %1133 = vpow2.f32 %v606_v51  ;;  %631 = vadd.xlane.f32.xlu1 %v630_v52  ;;  %625 = vadd.xlane.f32.xlu0 %v624_v53 }
 0x14e   : > { %v1134_v54 = vpop.eup %1133 }
 0x14f   : > { %v627_v55 = vsel %vm563_vm1, %v1134_v54, 0.0 }
 0x150   : > { %628 = vadd.xlane.f32.xlu1 %v627_v55 }
 0x1a5   : > { %v614_v56 = vpop.xlane.xlu2 %613 }
 0x1a6   : > { %1135 = vrcp.f32 %v614_v56 }
 0x1ab   : > { %v620_v57 = vpop.xlane.xlu0 %619 }
 0x1ac   : > { %v1136_v58 = vpop.eup %1135  ;;  %1137 = vrcp.f32 %v620_v57  ;;  %v623_v59 = vpop.xlane.xlu1 %622 }
 0x1ad   : > { %1139 = vrcp.f32 %v623_v59  ;;  %v644_v60 = vmul.f32 %v1136_v58, %v1120_v25 }
 0x1af   : > { %668 = vmatmul.f32.vlgmr.msrb.gmra.mxu0 %v644_v60 }
 0x1b0   : > { %1048 = vmatpush.xpose.msk.msrb.mxu0 %vm368_vm0, %v815_v16 }
 0x1b2   : > { %v1138_v61 = vpop.eup %1137 }
 0x1b3   : > { %v1140_v62 = vpop.eup %1139  ;;  %v617_v63 = vpop.xlane.xlu0 %616  ;;  %v646_v0 = vmul.f32 %v1138_v61, %v1122_v32 }
 0x1b4   : > { %1141 = vrcp.f32 %v617_v63  ;;  %v635_v1 = vpop.xlane.xlu2 %634  ;;  %v647_v2 = vmul.f32 %v1140_v62, %v1124_v35  ;;  %1049 = vmatpush.xpose.msk.msrb.mxu0 %vm368_vm0, %v814_v17 }
 0x1b5   : > { %1143 = vrcp.f32 %v635_v1  ;;  %708 = vmatmul.f32.vlgmr.msra.gmra.mxu2 %v646_v0 }
 0x1b6   : > { %728 = vmatmul.f32.vlgmr.msra.gmra.mxu3 %v647_v2 }
 0x1b8   : > { %1050 = vmatpush.xpose.msk.msrb.mxu0 %vm368_vm0, %v813_v18 }
 0x1ba   : > { %v1142_v3 = vpop.eup %1141 }
 0x1bb   : > { %v1144_v4 = vpop.eup %1143  ;;  %v626_v5 = vpop.xlane.xlu0 %625  ;;  %v645_v7 = vmul.f32 %v1142_v3, %v1126_v42 }
 0x1bc   : > { %v632_v6 = vpop.xlane.xlu1 %631  ;;  %v651_v8 = vmul.f32 %v1144_v4, %v1128_v45  ;;  %1145 = vrcp.f32 %v626_v5  ;;  %1051 = vmatpush.xpose.msk.msrb.mxu0 %vm368_vm0, %v812_v19 }
 0x1bd   : > { %1147 = vrcp.f32 %v632_v6  ;;  %688 = vmatmul.f32.vlgmr.msrb.gmra.mxu1 %v645_v7 }
 0x1be   : > { %808 = vmatmul.f32.vlgmr.msrb.gmra.mxu3 %v651_v8 }
 0x1c2   : > { %v1146_v9 = vpop.eup %1145 }
 0x1c3   : > { %v1148_v10 = vpop.eup %1147  ;;  %v648_v11 = vmul.f32 %v1146_v9, %v1130_v48 }
 0x1c4   : > { %v629_v12 = vpop.xlane.xlu1 %628  ;;  %v650_v13 = vmul.f32 %v1148_v10, %v1132_v50 }
 0x1c5   : > { %1149 = vrcp.f32 %v629_v12  ;;  %748 = vmatmul.f32.vlgmr.msra.gmra.mxu0 %v648_v11 }
 0x1c6   : > { %788 = vmatmul.f32.vlgmr.msrb.gmra.mxu2 %v650_v13 }
 0x1cb   : > { %v1150_v14 = vpop.eup %1149 }
 0x1cc   : > { %v649_v15 = vmul.f32 %v1150_v14, %v1134_v54 }
 0x1ce   : > { %768 = vmatmul.f32.vlgmr.msra.gmra.mxu1 %v649_v15 }
 0x22c   : > { %v669_v20 = vpop.f32.mrf.mxu0 }
 0x238   : > { %v709_v23 = vpop.f32.mrf.mxu2 }
 0x239   : > { %v729_v22 = vpop.f32.mrf.mxu3  ;;  %v830_v27 = vrot.slane %v709_v23, 6 }
 0x23a   : > { %v689_v21 = vpop.f32.mrf.mxu1  ;;  %v832_v30 = vrot.slane %v729_v22, 5 }
 0x23b   : > { %v828_v24 = vrot.slane %v689_v21, 7 }
 0x23d   : > { %v829_v25 = vsel %vm541_vm2, %v828_v24, %v669_v20 }
 0x23e   : > { %v831_v28 = vsel %vm544_vm3, %v830_v27, %v829_v25 }
 0x23f   : > { %v833_v34 = vsel %vm547_vm4, %v832_v30, %v831_v28 }
 0x241   : > { %v809_v32 = vpop.f32.mrf.mxu3 }
 0x242   : > { %v749_v26 = vpop.f32.mrf.mxu0  ;;  %v840_v38 = vrot.slane %v809_v32, 1 }
 0x243   : > { %v834_v29 = vrot.slane %v749_v26, 4 }
 0x245   : > { %v835_v36 = vsel %vm550_vm5, %v834_v29, %v833_v34 }
 0x249   : > { %v789_v31 = vpop.f32.mrf.mxu2 }
 0x24a   : > { %v838_v37 = vrot.slane %v789_v31, 2 }
 0x24b   : > { %v769_v33 = vpop.f32.mrf.mxu1 }
 0x24c   : > { %v836_v35 = vrot.slane %v769_v33, 3 }
 0x24e   : > { %v837_v39 = vsel %vm553_vm6, %v836_v35, %v835_v36 }
 0x24f   : > { %v839_v40 = vsel %vm556_vm7, %v838_v37, %v837_v39 }
 0x250   : > { %v841_v41 = vsel %vm559_vm8, %v840_v38, %v839_v40 }
 0x251   : > { %1052 = vmatmul.msk.f32.vlgmr.msrb.gmra.mxu0 %vm368_vm0, %v841_v41 }
 0x252   : > { %1208 = shalt.err (!%p1205_p7)
}
 0x253   : > { %1064 = dma.vmem_to_hbm [thread:$0]  (%p1369_p11), %s911_s11, 128, %s913_s16, %s884_s28   ;;  %v1118_v42 = vld [vmem:[%s1587_s4] ss:$0 sm:$0xff]  ;;  %vm876_vm9 = vcmask 261120  }
 0x254   : > { %s894_s13 = scalar_lea.hbm %s1588_s5, %s1055_s26  ;;  %s1596_s14 = sshll.u32 %s1405_s18, 3 }
 0x255   : > { %s289_s29 = scalar_lea.vmem [#allocation5], %s1596_s14  ;;  %s898_s17 = sshll.u32 %s894_s13, 4  ;;  %s899_s17 = int_to_ptr.hbm [resolvable:$true] %s898_s17 }
 0x256   : > { %s896_s12 = sshll.u32 %s289_s29, 4  ;;  %s879_s11 = scalar_lea.sflag [#allocation4], %s1405_s18  ;;  %s897_s12 = int_to_ptr.vmem [resolvable:$true] %s896_s12 }
 0x257   : > { %s1223_s16 = sshra.s32 %s899_s17, 4  ;;  %s1229_s20 = scalar_lea.hbm %s1588_s5, 16  ;;  %s1224_s16 = int_to_ptr.hbm [resolvable:$true] %s1223_s16 }
 0x258   : > { %s1225_s28 = scalar_lea.hbm %s1224_s16, 8  ;;  %p1230_p2 = scmp.lt.s32.totalorder %s1224_s16, %s1588_s5 }
 0x259   : > { %p1226_p5 = scmp.ne.s32.totalorder %s1224_s16, %s1225_s28  ;;  %p1231_p9 = scmp.lt.s32.totalorder %s1229_s20, %s1225_s28 }
 0x25b   : > { %p1227_p8 = pnand %p1226_p5, %p1369_p11  ;;  %p1232_p6 = por %p1231_p9, %p1230_p2 }
 0x25d   : > { %p1228_p10 = pneg %p1227_p8 }
 0x25f   : > { %p1233_p13 = pnand %p1232_p6, %p1228_p10 }
 0x2ce   : > { %v873_v43 = vpop.f32.mrf.mxu0 }
 0x2cf   : > { %v874_v45 = vadd.f32 %v1118_v42, %v873_v43 }
 0x2d1   : > { %877 = vst.msk [vmem:[%s289_s29] sm:$0xff] %vm876_vm9, %v874_v45 }
 0x2d2   : > { %1236 = shalt.err (!%p1233_p13)
}
 0x2d3   : > { %1063 = dma.vmem_to_hbm [thread:$0]  (%p1369_p11), %s897_s12, 128, %s899_s17, %s879_s11  }
 0x2d4 PF: > { %s924_s18 = sand.u32 1, %s1267_s21   ;;  %p1597_p0 = scmp.ge.s32.totalorder %s1279_s24, 2 }
 0x2d5   : > { %s925_s13 = scalar_lea.sflag [#allocation4], %s924_s18 }
 0x2d6   : > { %p1072_p1 = pnand %p1597_p0, %p1373_p12 }
 0x2d8   : > { %p1073_p3 = pneg %p1072_p1 }
 0x2da   : > { %1258 = dma.done.wait (%p1073_p3), %s925_s13, 128  }
 0x2db   : > { %1260 = vsyncadd (%p1073_p3), %s925_s13, 4294967168  ;;  %s935_s7 = scalar_lea.sflag [#allocation7], %s924_s18 }
 0x2dc   : > { %1262 = dma.done.wait (%p1073_p3), %s935_s7, 128  }
 0x2dd   : > { %1264 = vsyncadd (%p1073_p3), %s935_s7, 4294967168  ;;  %p23_p11 = scmp.ge.s32.totalorder %s1344_s27, 4   ;;  %s1598_s21 = smov %s1271_s22 }
 0x2de   : > { %s1599_s22 = smov %s1275_s23  ;;  %s1600_s23 = smov %s1356_s30 }
 0x2df   : > { %s1601_s24 = smov %s1344_s27  ;;  %25 = sbr.rel (!%p23_p11) target bundleno = 7 (0x7), region = 105 }
 0x2e4   :  { %941 = vsyncpa [#allocation3], 1 }
 0x2e5   :  { %943 = vsyncpa [#allocation3 + $0x1], 1 }
 0x2e6   :  { %944 = vsyncpa [#allocation4], 1 }
 0x2e7   :  { %946 = vsyncpa [#allocation4 + $0x1], 1 }
 0x2e8   :  { %947 = vsyncpa [#allocation7], 1 }
 0x2e9   :  { %949 = vsyncpa [#allocation7 + $0x1], 1 }

</bundles_post_ra>
